<compile_context>
chip_gen: v7x
topology: tpu7x:2x2x1
jax: 0.10.0
libtpu: 0.0.40
codegen_flags: <defaults>
</compile_context>

<pallas_src>
import jax
import jax.numpy as jnp
from jax.experimental import pallas as pl
from jax.experimental.pallas import tpu as pltpu


def classifier_kernel(pooled_ref, wt_ref, b_ref, out_ref):
    # pooled_ref: [B, D], wt_ref: [D, TC], b_ref: [1, TC], out_ref: [B, TC]
    logits = jnp.dot(pooled_ref[...], wt_ref[...],
                     preferred_element_type=jnp.float32) + b_ref[...]      # [B, TC]
    # nn.Dropout(0.15): identity in eval/inference mode.
    # TODO(synk): training-mode dropout (random keep-mask scaled by 1/(1-p)) not applied.
    # nn.Softmax(dim=0): softmax over the BATCH axis, as written in the module.
    # Each class column is normalized independently, so tiling over classes is safe.
    m = jnp.max(logits, axis=0, keepdims=True)
    e = jnp.exp(logits - m)
    denom = jnp.sum(e, axis=0, keepdims=True)
    # approx=False keeps full precision; flip to approx=True if tolerance allows.
    out_ref[...] = (e * pl.reciprocal(denom, approx=False)).astype(out_ref.dtype)


def baseline_classifier(pooled, weight, bias, *, class_tile=128, compute_dtype=None):
    """pooled: [B, D] f32 (CLS token), weight: [C, D] f32 (PyTorch Linear layout),
    bias: [C] f32. Returns softmax(dim=0)(pooled @ W.T + b) as [B, C] f32."""
    B, D = pooled.shape
    C = weight.shape[0]
    # Pad the class dim to a lane-dense multiple of 128 (done once; constant-folds
    # under jit since the weights are traced-constant shapes).
    Cp = ((C + class_tile - 1) // class_tile) * class_tile
    wt = weight.T                                                   # [D, C]
    b = bias
    if Cp != C:
        wt = jnp.pad(wt, ((0, 0), (0, Cp - C)))                     # [D, Cp]
        b = jnp.pad(b, (0, Cp - C))                                 # [Cp]
    b2 = b.reshape(1, Cp)

    if compute_dtype is not None:
        # bf16 MXU operands (f32 accumulation via preferred_element_type);
        # biggest relative win on v5e, also halves weight DMA bytes.
        pooled = pooled.astype(compute_dtype)
        wt = wt.astype(compute_dtype)

    n_class_tiles = Cp // class_tile
    out = pl.pallas_call(
        classifier_kernel,
        out_shape=jax.ShapeDtypeStruct((B, Cp), jnp.float32),
        grid=(n_class_tiles,),
        in_specs=[
            pl.BlockSpec((B, D), lambda j: (0, 0)),                 # full batch (softmax over B)
            pl.BlockSpec((D, class_tile), lambda j: (0, j)),
            pl.BlockSpec((1, class_tile), lambda j: (0, j)),
        ],
        out_specs=pl.BlockSpec((B, class_tile), lambda j: (0, j)),
        compiler_params=pltpu.CompilerParams(
            dimension_semantics=("parallel",)),                     # class tiles are independent
    )(pooled, wt, b2)
    return out[:, :C]


def mock_frozen_llm_cls(input_ids, attention_mask, emb_table):
    """Stand-in for the frozen llm_trained_model, producing only the CLS row of
    last_hidden_state ([B, D]) — no [B, S, D] intermediate is materialized.
    Plain-JAX glue (the real backbone is an external trained model)."""
    cls_ids = input_ids[:, 0]                                       # [B]
    pooled = emb_table[cls_ids]                                     # [B, D]
    pooled = pooled * attention_mask[:, 0, None].astype(pooled.dtype)
    return pooled


def baseline_model_forward(input_ids, attention_mask, emb_table, weight, bias):
    pooled = mock_frozen_llm_cls(input_ids, attention_mask, emb_table)
    return baseline_classifier(pooled, weight, bias)


if __name__ == "__main__":
    # Small shapes consistent with the module's forward.
    B, S, D, C, VOCAB = 2, 8, 32, 8, 50

    key = jax.random.PRNGKey(0)
    k_ids, k_emb, k_w, k_b = jax.random.split(key, 4)

    input_ids = jax.random.randint(k_ids, (B, S), 0, VOCAB, dtype=jnp.int32)
    attention_mask = jnp.ones((B, S), dtype=jnp.int32)

    # Deterministic synthetic parameters (shapes follow the module's __init__).
    emb_table = jax.random.normal(k_emb, (VOCAB, D), dtype=jnp.float32) * 0.1
    weight = jax.random.normal(k_w, (C, D), dtype=jnp.float32) * 0.05   # nn.Linear(D, C).weight
    bias = jax.random.normal(k_b, (C,), dtype=jnp.float32) * 0.01       # nn.Linear(D, C).bias

    fwd = jax.jit(baseline_model_forward)
    probs = fwd(input_ids, attention_mask, emb_table, weight, bias)
    probs = jax.block_until_ready(probs)

    # Reference check against pure JAX (eval-mode forward, full hidden state).
    hidden_ref = emb_table[input_ids] * attention_mask[..., None].astype(jnp.float32)
    pooled_ref = hidden_ref[:, 0]
    logits_ref = pooled_ref @ weight.T + bias
    ref = jax.nn.softmax(logits_ref, axis=0)
    assert probs.shape == (B, C)
    assert jnp.allclose(probs, ref, atol=1e-5, rtol=1e-5)

    print("KERNEL_OK")
</pallas_src>

<mosaic_0001>
module attributes {stable_mosaic.version = 11 : i64} {
  func.func @classifier_kernel(%arg0: i32, %arg1: memref<2x32xf32, #tpu.memory_space<vmem>>, %arg2: memref<32x128xf32, #tpu.memory_space<vmem>>, %arg3: memref<1x128xf32, #tpu.memory_space<vmem>>, %arg4: memref<2x128xf32, #tpu.memory_space<vmem>>) attributes {dimension_semantics = [#tpu.dimension_semantics<parallel>], iteration_bounds = array<i64: 1>, scalar_prefetch = 0 : i64, scratch_operands = 0 : i64, tpu.core_type = #tpu.core_type<tc>, window_params = [{pipeline_mode = #tpu.pipeline_mode<synchronous>, transform_indices = @transform_0, window_bounds = array<i64: 2, 32>}, {transform_indices = @transform_1, window_bounds = array<i64: 32, 128>}, {transform_indices = @transform_2, window_bounds = array<i64: 1, 128>}, {transform_indices = @transform_3, window_bounds = array<i64: 2, 128>}]} {
    %c0 = arith.constant 0 : index
    %c0_0 = arith.constant 0 : index
    %0 = vector.load %arg1[%c0, %c0_0] : memref<2x32xf32, #tpu.memory_space<vmem>>, vector<2x32xf32>
    %c0_1 = arith.constant 0 : index
    %c0_2 = arith.constant 0 : index
    %1 = vector.load %arg2[%c0_1, %c0_2] : memref<32x128xf32, #tpu.memory_space<vmem>>, vector<32x128xf32>
    %cst = arith.constant dense<0.000000e+00> : vector<2x128xf32>
    %2 = tpu.matmul %0, %1, %cst {dimension_numbers = #tpu.dot_dimension_numbers<[1], [0], [0], [1], [0, 0, 1, 1], [], []>} : vector<2x32xf32>, vector<32x128xf32>, vector<2x128xf32> -> vector<2x128xf32>
    %c0_3 = arith.constant 0 : index
    %c0_4 = arith.constant 0 : index
    %3 = vector.load %arg3[%c0_3, %c0_4] : memref<1x128xf32, #tpu.memory_space<vmem>>, vector<1x128xf32>
    %4 = vector.broadcast %3 : vector<1x128xf32> to vector<2x128xf32>
    %5 = arith.addf %2, %4 : vector<2x128xf32>
    %cst_5 = arith.constant dense<0xFF800000> : vector<128xf32>
    %6 = vector.multi_reduction <maximumf>, %5, %cst_5 [0] : vector<2x128xf32> to vector<128xf32>
    %7 = vector.shape_cast %6 : vector<128xf32> to vector<1x128xf32>
    %8 = vector.broadcast %7 : vector<1x128xf32> to vector<2x128xf32>
    %9 = arith.subf %5, %8 : vector<2x128xf32>
    %10 = math.exp %9 : vector<2x128xf32>
    %cst_6 = arith.constant dense<0.000000e+00> : vector<128xf32>
    %11 = vector.multi_reduction <add>, %10, %cst_6 [0] : vector<2x128xf32> to vector<128xf32>
    %12 = vector.shape_cast %11 : vector<128xf32> to vector<1x128xf32>
    %13 = tpu.reciprocal %12 : vector<1x128xf32> -> vector<1x128xf32>
    %14 = vector.broadcast %13 : vector<1x128xf32> to vector<2x128xf32>
    %15 = arith.mulf %10, %14 : vector<2x128xf32>
    %c0_7 = arith.constant 0 : index
    %c0_8 = arith.constant 0 : index
    %16 = vector.load %arg4[%c0_7, %c0_8] : memref<2x128xf32, #tpu.memory_space<vmem>>, vector<2x128xf32>
    tpu.vector_store %arg4[%c0_7, %c0_8], %15 {strides = array<i32>} : memref<2x128xf32, #tpu.memory_space<vmem>>, vector<2x128xf32>,
    return
  }
  func.func @transform_0(%arg0: i32) -> (i32, i32) {
    %c0_i32 = arith.constant 0 : i32
    %c0_i32_0 = arith.constant 0 : i32
    %c0_i32_1 = arith.constant 0 : i32
    return %c0_i32, %c0_i32_0 : i32, i32
  }
  func.func @transform_1(%arg0: i32) -> (i32, i32) {
    %c0_i32 = arith.constant 0 : i32
    %c0_i32_0 = arith.constant 0 : i32
    return %c0_i32, %arg0 : i32, i32
  }
  func.func @transform_2(%arg0: i32) -> (i32, i32) {
    %c0_i32 = arith.constant 0 : i32
    %c0_i32_0 = arith.constant 0 : i32
    return %c0_i32, %arg0 : i32, i32
  }
  func.func @transform_3(%arg0: i32) -> (i32, i32) {
    %c0_i32 = arith.constant 0 : i32
    %c0_i32_0 = arith.constant 0 : i32
    return %c0_i32, %arg0 : i32, i32
  }
}

</mosaic_0001>

<bundles_post_ra>
// kernel: baseline_model_forward.1
= control target key start
LH: loop header
LB: loop body
LE: loop exit
PB: predicated region body
PF: predicated region fallthrough
CT: control target
= control target key end

     0   :  { %v192_v3 = vmov 0.0|0.0   ;;  %vm193_vm0 = vmmov 0   ;;  %v194_v6 = vmov 0.0   ;;  %s246_s0 = inlined_call_operand.vmem [shape: f32[2,32], index: 0, kind: input, shape index: {}]   ;;  %s247_s1 = inlined_call_operand.vmem [shape: f32[32,128], index: 1, kind: input, shape index: {}]   ;;  %s248_s2 = inlined_call_operand.vmem [shape: f32[1,128], index: 2, kind: input, shape index: {}]   ;;  %s249_s3 = inlined_call_operand.hbm [shape: f32[2,128], index: 3, kind: output, shape index: {}]  }
   0x1   :  { %v16_v0 = vld [vmem:[%s247_s1] sm:$0xff]  ;;  %v17_v1 = vld [vmem:[%s247_s1 + $0x8] sm:$0xff]  ;;  %v18_v2 = vld [vmem:[%s247_s1 + $0x10] sm:$0xff]  ;;  %154 = vmatprep.subr.bf16.mxu0 %v192_v3  ;;  %151 = vmatprep.mubr.msk.f32.mxu0 %vm193_vm0, %v194_v6 }
   0x2   :  { %v155_v4 = vpack.c.bf16 %v17_v1, %v16_v0  ;;  %v19_v5 = vld [vmem:[%s247_s1 + $0x18] sm:$0xff] }
   0x3   :  { %8 = vsyncpa [#allocation3], 0  ;;  %v158_v7 = vpack.c.bf16 %v19_v5, %v18_v2  ;;  %v15_v8 = vld [vmem:[%s246_s0] sm:$0x3]  ;;  %vm27_vm1 = vcmask 261120   ;;  %vm101_vm2 = vcmask 1041408  }
   0x4   :  { %156 = vmatpush3.bf16.msra.mxu0 %v155_v4  ;;  %v136_v9 = vld [vmem:[%s248_s2] ss:$0 sm:$0xff]  ;;  %s195_s0 = smov [#allocation2]  }
   0x5   :  { %157 = vmatprep.subr.bf16.mxu0 %v192_v3  ;;  %s128_s1 = sshll.u32 %s195_s0, 4  ;;  %s129_s1 = int_to_ptr.vmem [resolvable:$true] %s128_s1 }
   0x6   :  { %s168_s2 = scalar_lea.vmem %s129_s1, 32  ;;  %p173_p1 = scmp.lt.s32.totalorder %s129_s1, %s129_s1 }
   0x7   :  { %p169_p0 = scmp.ne.s32.totalorder %s129_s1, %s168_s2  ;;  %p174_p2 = scmp.lt.s32.totalorder %s168_s2, %s168_s2 }
   0x8   :  { %159 = vmatpush3.bf16.msra.mxu0 %v158_v7 }
   0x9   :  { %p175_p3 = por %p174_p2, %p173_p1 }
   0xb   :  { %152 = vmatmul.mubr.msk.f32.vlgmr.msra.gmra.mrb[0].mxu0 %vm27_vm1, %v15_v8  ;;  %p176_p4 = pnand %p175_p3, %p169_p0 }
  0xde   :  { %v97_v10 = vpop.f32.mrb[0].mxu0 }
  0xdf   :  { %v98_v11 = vadd.f32 %v136_v9, %v97_v10  ;;  %v153_v12 = vpop.f32.mrb[1].mxu0 }
  0xe1   :  { %v102_v13 = vsel %vm101_vm2, %v98_v11, -inf }
  0xe2   :  { %v103_v14 = vrot.slane %v102_v13, 4 }
  0xe4   :  { %v104_v15 = vmax.f32 %v102_v13, %v103_v14 }
  0xe6   :  { %v105_v16 = vrot.slane %v104_v15, 2 }
  0xe8   :  { %v106_v17 = vmax.f32 %v104_v15, %v105_v16 }
  0xea   :  { %v107_v18 = vrot.slane %v106_v17, 1 }
  0xec   :  { %v108_v19 = vmax.f32 %v106_v17, %v107_v18 }
  0xee   :  { %v109_v20 = vsub.f32 %v98_v11, %v108_v19 }
  0xf0   :  { %v110_v21 = vmul.f32 1.442695, %v109_v20 }
  0xf2   :  { %164 = vpow2.f32 %v110_v21 }
  0xfc   :  { %v165_v22 = vpop.eup %164 }
  0xfd   :  { %v112_v23 = vsel %vm101_vm2, %v165_v22, 0.0 }
  0xfe   :  { %v113_v24 = vrot.slane %v112_v23, 4 }
 0x100   :  { %v114_v25 = vadd.f32 %v113_v24, %v112_v23 }
 0x102   :  { %v115_v26 = vrot.slane %v114_v25, 2 }
 0x104   :  { %v116_v27 = vadd.f32 %v115_v26, %v114_v25 }
 0x106   :  { %v117_v28 = vrot.slane %v116_v27, 1 }
 0x108   :  { %v118_v29 = vadd.f32 %v117_v28, %v116_v27 }
 0x10a   :  { %166 = vrcp.f32 %v118_v29 }
 0x114   :  { %v167_v30 = vpop.eup %166 }
 0x115   :  { %v120_v31 = vmul.f32 %v167_v30, %v165_v22 }
 0x117   :  { %121 = vst [vmem:[#allocation2] sm:$0x3] %v120_v31 }
 0x118   :  { %179 = shalt.err (!%p176_p4)
}
 0x119   :  { %s180_s26 = scalar_lea.hbm %s249_s3, 32 }
 0x11a   :  { %p181_p5 = scmp.ne.s32.totalorder %s249_s3, %s180_s26  ;;  %p184_p6 = scmp.lt.u32.totalorder %s180_s26, %s249_s3 }
 0x11c   :  { %p186_p7 = pnand %p184_p6, %p181_p5 }
 0x11e   :  { %189 = shalt.err (!%p186_p7)
}
 0x11f   :  { %131 = dma.vmem_to_hbm [thread:$0]  %s129_s1, 32, %s249_s3, [#allocation3]  }
 0x120   :  { %190 = dma.done.wait [#allocation3], 32  }
 0x121   :  { %191 = vsyncadd [#allocation3], 4294967264 }
 0x122   :  { %135 = vsyncpa [#allocation3], 1 }

</bundles_post_ra>
